<compile_context>
chip_gen: v6e
topology: v6e:2x2x1
jax: 0.10.0
libtpu: 0.0.40
codegen_flags: <defaults>
</compile_context>

<pallas_src>
import functools

import jax
import jax.numpy as jnp
from jax.experimental import pallas as pl
from jax.experimental.pallas import tpu as pltpu

_LANE = 128
_SUBLANE = 8


def _round_up(x, m):
    return ((x + m - 1) // m) * m


def _cdiv(a, b):
    return (a + b - 1) // b


def _vmem_capacity_bytes():
    """Physical VMEM per TensorCore; conservative (v7x) fallback."""
    try:
        return int(pltpu.get_tpu_info().vmem_capacity_bytes)
    except Exception:
        return 64 * 1024 * 1024


def _ce_partial_kernel(pred_ref, tgt_ref, out_ref, *, n_classes, n_rows,
                       tile_rows):
    """Per-tile partial CE sum, broadcast into a lane-dense (1, 8, 128) block."""
    x = pred_ref[...]                                    # (TR, C), input dtype
    tgt = tgt_ref[...]                                   # (TR, 1) int32

    # Row max in the input dtype (max is exact; keeps only one f32 tile live
    # afterwards).  shifted <= 0, exact in f32.
    m = jnp.max(x, axis=-1, keepdims=True)               # (TR, 1)
    shifted = x.astype(jnp.float32) - m.astype(jnp.float32)  # (TR, C) f32

    sumexp = jnp.sum(jnp.exp(shifted), axis=-1, keepdims=True)   # (TR, 1)

    # Shifted target logit via one-hot select (no dynamic gather on TPU):
    #   lse - logit[tgt] == log(sumexp) - (logit[tgt] - m) == log(sumexp) - shifted[tgt]
    cls_ids = jax.lax.broadcasted_iota(jnp.int32, shifted.shape, 1)
    tgt_shifted = jnp.sum(jnp.where(cls_ids == tgt, shifted, 0.0),
                          axis=-1, keepdims=True)                 # (TR, 1)

    # Mask rows past the true row count (ragged last tile reads unspecified
    # data) and, as a safety net, out-of-range targets (they contribute 0).
    row_ids = (pl.program_id(0) * tile_rows
               + jax.lax.broadcasted_iota(jnp.int32, tgt.shape, 0))
    valid = (row_ids < n_rows) & (tgt >= 0) & (tgt < n_classes)
    per_row = jnp.where(valid, jnp.log(sumexp) - tgt_shifted, 0.0)

    # Lane-dense, unmasked full-tile store; each program owns its own output
    # block so the grid axis is fully "parallel"; epilogue lives in the wrapper.
    out_ref[...] = jnp.broadcast_to(jnp.sum(per_row), out_ref.shape)


def sequential_cross_entropy_loss(pred, target, *, tile_rows=None):
    """pred: (..., C) float; target: (...) int. Returns scalar mean CE loss."""
    n_classes = pred.shape[-1]
    pred_flat = pred.reshape(-1, n_classes)          # no padding, no extra HBM pass
    target_flat = target.reshape(-1).astype(jnp.int32)
    n_rows = pred_flat.shape[0]
    target_2d = target_flat.reshape(-1, 1)

    itemsize = jnp.dtype(pred_flat.dtype).itemsize
    c_eff = _round_up(n_classes, _LANE)              # lane-padded width of VMEM tiles

    # Chip-aware VMEM budgets: v7x (64 MiB) -> limit 48 MiB / tile budget 24 MiB;
    # v5e/v6e (128 MiB) -> limit 96 MiB / tile budget 48 MiB.
    vmem_cap = _vmem_capacity_bytes()
    vmem_limit = min((vmem_cap * 3) // 4, 100 * 1024 * 1024)
    tile_budget = vmem_limit // 2

    # Per-row VMEM bytes: double-buffered input tile (lane-padded), ~3 live f32
    # temporaries in the kernel body, and the (TR,1) int32 target block which
    # tiles to TR x 128 words (double-buffered).
    per_row_bytes = c_eff * (2 * itemsize + 3 * 4) + 2 * _LANE * 4

    if tile_rows is None:
        tile_rows = max(_SUBLANE, tile_budget // per_row_bytes)
    tile_rows = max(_SUBLANE, _round_up(int(tile_rows), _SUBLANE))
    # Give the "parallel" grid axis >= 2 tiles whenever possible (megacore on v7x).
    tile_rows = min(tile_rows, _round_up(_cdiv(n_rows, 2), _SUBLANE))
    tile_rows = max(_SUBLANE, tile_rows)

    num_tiles = _cdiv(n_rows, tile_rows)
    kernel = functools.partial(_ce_partial_kernel, n_classes=n_classes,
                               n_rows=n_rows, tile_rows=tile_rows)

    cost = pl.CostEstimate(
        flops=5 * n_rows * n_classes,
        transcendentals=n_rows * n_classes,
        bytes_accessed=(n_rows * n_classes * itemsize + n_rows * 4
                        + num_tiles * _SUBLANE * _LANE * 4),
    )

    partials = pl.pallas_call(
        kernel,
        out_shape=jax.ShapeDtypeStruct((num_tiles, _SUBLANE, _LANE),
                                       jnp.float32),
        grid_spec=pltpu.PrefetchScalarGridSpec(
            num_scalar_prefetch=0,
            grid=(num_tiles,),
            in_specs=[
                # Last block dim == full array dim C (no 128-divisibility needed).
                pl.BlockSpec((tile_rows, n_classes), lambda i: (i, 0)),
                pl.BlockSpec((tile_rows, 1), lambda i: (i, 0)),
            ],
            out_specs=pl.BlockSpec((1, _SUBLANE, _LANE), lambda i: (i, 0, 0)),
        ),
        compiler_params=pltpu.CompilerParams(
            dimension_semantics=("parallel",),
            vmem_limit_bytes=int(vmem_limit),
        ),
        cost_estimate=cost,
    )(pred_flat, target_2d)

    # Tiny epilogue reduction in plain JAX (each tile broadcast its partial).
    return jnp.sum(partials[:, 0, 0]) / jnp.float32(n_rows)


if __name__ == "__main__":
    key = jax.random.PRNGKey(0)
    k_pred, k_tgt = jax.random.split(key)

    batch, seq, n_classes = 2, 8, 32
    pred = jax.random.normal(k_pred, (batch, seq, n_classes), dtype=jnp.float32)
    target = jax.random.randint(k_tgt, (batch, seq), 0, n_classes,
                                dtype=jnp.int32)

    loss = sequential_cross_entropy_loss(pred, target)
    loss = jax.block_until_ready(loss)

    # Pure-JAX reference (log-softmax cross-entropy, mean reduction).
    pf = pred.reshape(-1, n_classes)
    tf = target.reshape(-1)
    logp = jax.nn.log_softmax(pf, axis=-1)
    ref = -jnp.mean(jnp.take_along_axis(logp, tf[:, None], axis=-1))
    assert jnp.allclose(loss, ref, atol=1e-5, rtol=1e-5), (loss, ref)

    print("KERNEL_OK")
</pallas_src>

<mosaic_0001>
module attributes {stable_mosaic.version = 11 : i64} {
  func.func @_ce_partial_kernel(%arg0: i32, %arg1: memref<8x32xf32, #tpu.memory_space<vmem>>, %arg2: memref<8x1xi32, #tpu.memory_space<vmem>>, %arg3: memref<1x8x128xf32, #tpu.memory_space<vmem>>) attributes {dimension_semantics = [#tpu.dimension_semantics<parallel>], iteration_bounds = array<i64: 2>, scalar_prefetch = 0 : i64, scratch_operands = 0 : i64, tpu.core_type = #tpu.core_type<tc>, window_params = [{transform_indices = @transform_0, window_bounds = array<i64: 8, 32>}, {transform_indices = @transform_1, window_bounds = array<i64: 8, 1>}, {transform_indices = @transform_2, window_bounds = array<i64: 1, 8, 128>}]} {
    %c0 = arith.constant 0 : index
    %c0_0 = arith.constant 0 : index
    %0 = vector.load %arg1[%c0, %c0_0] : memref<8x32xf32, #tpu.memory_space<vmem>>, vector<8x32xf32>
    %c0_1 = arith.constant 0 : index
    %c0_2 = arith.constant 0 : index
    %1 = vector.load %arg2[%c0_1, %c0_2] : memref<8x1xi32, #tpu.memory_space<vmem>>, vector<8x1xi32>
    %cst = arith.constant dense<0xFF800000> : vector<8xf32>
    %2 = vector.multi_reduction <maximumf>, %0, %cst [1] : vector<8x32xf32> to vector<8xf32>
    %3 = vector.shape_cast %2 : vector<8xf32> to vector<8x1xf32>
    %4 = vector.broadcast %3 : vector<8x1xf32> to vector<8x32xf32>
    %5 = arith.subf %0, %4 : vector<8x32xf32>
    %6 = math.exp %5 : vector<8x32xf32>
    %cst_3 = arith.constant dense<0.000000e+00> : vector<8xf32>
    %7 = vector.multi_reduction <add>, %6, %cst_3 [1] : vector<8x32xf32> to vector<8xf32>
    %8 = vector.shape_cast %7 : vector<8xf32> to vector<8x1xf32>
    %9 = tpu.iota {dimensions = array<i32: 1>} : vector<8x32xi32>
    %10 = vector.broadcast %1 : vector<8x1xi32> to vector<8x32xi32>
    %11 = arith.cmpi eq, %9, %10 : vector<8x32xi32>
    %cst_4 = arith.constant 0.000000e+00 : f32
    %12 = vector.broadcast %cst_4 : f32 to vector<8x32xf32>
    %13 = arith.select %11, %5, %12 : vector<8x32xi1>, vector<8x32xf32>
    %cst_5 = arith.constant dense<0.000000e+00> : vector<8xf32>
    %14 = vector.multi_reduction <add>, %13, %cst_5 [1] : vector<8x32xf32> to vector<8xf32>
    %15 = vector.shape_cast %14 : vector<8xf32> to vector<8x1xf32>
    %c8_i32 = arith.constant 8 : i32
    %16 = arith.muli %arg0, %c8_i32 : i32
    %17 = tpu.iota {dimensions = array<i32: 0>} : vector<8x1xi32>
    %18 = vector.broadcast %16 : i32 to vector<8x1xi32>
    %19 = arith.addi %18, %17 : vector<8x1xi32>
    %c16_i32 = arith.constant 16 : i32
    %20 = vector.broadcast %c16_i32 : i32 to vector<8x1xi32>
    %21 = arith.cmpi slt, %19, %20 : vector<8x1xi32>
    %c0_i32 = arith.constant 0 : i32
    %22 = vector.broadcast %c0_i32 : i32 to vector<8x1xi32>
    %23 = arith.cmpi sge, %1, %22 : vector<8x1xi32>
    %24 = arith.andi %21, %23 : vector<8x1xi1>
    %c32_i32 = arith.constant 32 : i32
    %25 = vector.broadcast %c32_i32 : i32 to vector<8x1xi32>
    %26 = arith.cmpi slt, %1, %25 : vector<8x1xi32>
    %27 = arith.andi %24, %26 : vector<8x1xi1>
    %28 = math.log %8 : vector<8x1xf32>
    %29 = arith.subf %28, %15 : vector<8x1xf32>
    %cst_6 = arith.constant 0.000000e+00 : f32
    %30 = vector.broadcast %cst_6 : f32 to vector<8x1xf32>
    %31 = arith.select %27, %29, %30 : vector<8x1xi1>, vector<8x1xf32>
    %32 = vector.shape_cast %31 : vector<8x1xf32> to vector<1x8x1xf32>
    %cst_7 = arith.constant dense<0.000000e+00> : vector<1xf32>
    %33 = vector.multi_reduction <add>, %32, %cst_7 [1, 2] : vector<1x8x1xf32> to vector<1xf32>
    %34 = vector.shape_cast %33 : vector<1xf32> to vector<1x1x1xf32>
    %35 = vector.extract %34[0, 0, 0] : f32 from vector<1x1x1xf32>
    %36 = vector.broadcast %35 : f32 to vector<1x8x128xf32>
    %c0_8 = arith.constant 0 : index
    %c0_9 = arith.constant 0 : index
    %c0_10 = arith.constant 0 : index
    %37 = vector.load %arg3[%c0_8, %c0_9, %c0_10] : memref<1x8x128xf32, #tpu.memory_space<vmem>>, vector<1x8x128xf32>
    tpu.vector_store %arg3[%c0_8, %c0_9, %c0_10], %36 {strides = array<i32>} : memref<1x8x128xf32, #tpu.memory_space<vmem>>, vector<1x8x128xf32>,
    return
  }
  func.func @transform_0(%arg0: i32) -> (i32, i32) {
    %c0_i32 = arith.constant 0 : i32
    %c0_i32_0 = arith.constant 0 : i32
    return %arg0, %c0_i32 : i32, i32
  }
  func.func @transform_1(%arg0: i32) -> (i32, i32) {
    %c0_i32 = arith.constant 0 : i32
    %c0_i32_0 = arith.constant 0 : i32
    return %arg0, %c0_i32 : i32, i32
  }
  func.func @transform_2(%arg0: i32) -> (i32, i32, i32) {
    %c0_i32 = arith.constant 0 : i32
    %c0_i32_0 = arith.constant 0 : i32
    %c0_i32_1 = arith.constant 0 : i32
    return %arg0, %c0_i32, %c0_i32_0 : i32, i32, i32
  }
}

</mosaic_0001>

<bundles_post_ra>
// kernel: tpu_custom_call.1
= control target key start
LH: loop header
LB: loop body
LE: loop exit
PB: predicated region body
PF: predicated region fallthrough
CT: control target
= control target key end

     0   :  { %7 = vsyncpa [#allocation3], 0  ;;  %s528_s0 = inlined_call_operand.vmem [shape: f32[16,32], index: 0, kind: input, shape index: {}]   ;;  %s529_s1 = inlined_call_operand.vmem [shape: s32[16,1], index: 1, kind: input, shape index: {}]   ;;  %s530_s2 = inlined_call_operand.hbm [shape: f32[2,8,128], index: 2, kind: output, shape index: {}]  }
   0x1   :  { %9 = vsyncpa [#allocation3 + $0x1], 0  ;;  %s428_s9 = smov 0   ;;  %s430_s10 = smov 0  }
   0x2   :  { %s432_s11 = smov 0   ;;  %s434_s12 = smov 0  }
   0x3 LB: > { %s449_s13 = sadd.s32 4294967295, %s409_s12   ;;  %s290_s14 = sadd.s32 4294967294, %s409_s12   ;;  %s409_s12 = sphi %s434_s12, %s536_s12   ;;  %s405_s11 = sphi %s432_s11, %s535_s11   ;;  %s401_s10 = sphi %s430_s10, %s534_s10   ;;  %s397_s9 = sphi %s428_s9, %s533_s9  }
   0x4   : > { %s453_s15 = sadd.s32 1, %s409_s12   ;;  %s74_s16 = sadd.s32 1, %s405_s11 }
   0x5   : > { %s71_s17 = ssub.s32 %s409_s12, %s453_s15  ;;  %p84_p0 = scmp.ne.s32.totalorder %s405_s11, %s401_s10 }
   0x6   : > { %p72_p1 = scmp.eq.s32.totalorder %s71_s17, 0  ;;  %p85_p2 = scmp.eq.s32.totalorder %s449_s13, 1 }
   0x7   : > { %p90_p3 = scmp.ne.s32.totalorder %s401_s10, %s397_s9  ;;  %p91_p4 = scmp.eq.s32.totalorder %s290_s14, 1 }
   0x8   : > { %s464_s18 = scalar_select %p72_p1, %s405_s11, %s74_s16  }
   0x9   : > { %p466_p5 = por %p85_p2, %p84_p0  ;;  %p470_p6 = por %p91_p4, %p90_p3 }
   0xa   : > { %p293_p7 = scmp.ge.s32.totalorder %s409_s12, 1  ;;  %p123_p8 = scmp.lt.s32.totalorder %s409_s12, 3 }
   0xc   : > { %p124_p9 = pnand %p293_p7, %p123_p8 }
   0xd   : > { %p148_p10 = scmp.lt.s32.totalorder (!%p124_p9), %s449_s13, 1  ;;  %s297_s29 = sshll.u32 (!%p124_p9), %s449_s13, 3 }
   0xe   : > { %127 = sbr.rel (%p124_p9) target bundleno = 554 (0x22a), region = 28  ;;  %s145_s30 = sand.u32 (!%p124_p9), 1, %s401_s10  }
   0xf   : > { %s294_s3 = sshll.u32 (!%p124_p9), %s145_s30, 3  ;;  %s299_s6 = sshll.u32 (!%p124_p9), %s449_s13, 7 }
  0x10   : > { %s147_s4 = scalar_lea.vmem (!%p124_p9), [#allocation2], %s294_s3  ;;  %s217_s16 = scalar_lea.hbm (!%p124_p9), %s530_s2, %s299_s6 }
  0x11   : > { %s219_s5 = sshll.u32 (!%p124_p9), %s147_s4, 4  ;;  %s206_s17 = scalar_lea.sflag (!%p124_p9), [#allocation3], %s145_s30  ;;  %s490_s5 = int_to_ptr.vmem [resolvable:$true] %s219_s5 }
  0x13   : > { %v411_v0 = vmov 0   ;;  %s149_s21 = scalar_select %p148_p10, %s449_s13, 1  ;;  %vm158_vm0 = vcmask 261120   ;;  %v168_v7 = vlaneseq  ;;  %v181_v16 = vstv %s297_s29 }
  0x14   : > { %344 = vset.pattern.permute.xlu0 %v411_v0  ;;  %vm192_vm7 = vcmask 7168  }
  0x15   : > { %s295_s22 = sshll.u32 %s149_s21, 3  ;;  %v169_v8 = vand.u32 127, %v168_v7  ;;  %v180_v15 = vshrl.u32 %v168_v7, 7  ;;  %s349_s21 = scalar_lea.vmem %s490_s5, 128 }
  0x16   : > { %s151_s25 = scalar_lea.vmem %s528_s0, %s295_s22  ;;  %s155_s28 = scalar_lea.vmem %s529_s1, %s295_s22 }
  0x17   : > { %v156_v1 = vld [vmem:[%s151_s25] sm:$0xff]  ;;  %v182_v17 = vadd.s32 %v181_v16, %v180_v15  ;;  %p350_p11 = scmp.ne.s32.totalorder %s490_s5, %s349_s21  ;;  %s412_s22 = smov [#allocation2]  }
  0x18   : > { %v159_v2 = vsel %vm158_vm0, %v156_v1, -inf  ;;  %v157_v3 = vld [vmem:[%s155_s28] sm:$0xff]  ;;  %s353_s13 = sshll.u32 %s412_s22, 4  ;;  %s354_s13 = int_to_ptr.vmem [resolvable:$false] %s353_s13 }
  0x19   : > { %160 = vmax.xlane.f32.xlu0 %v159_v2  ;;  %vm184_vm2 = vcmp.ge.s32.totalorder %v157_v3, 0  ;;  %vm183_vm3 = vcmp.lt.s32.totalorder %v182_v17, 16  ;;  %vm186_vm5 = vcmp.lt.s32.totalorder %v157_v3, 32  ;;  %p351_p12 = pnand %p350_p11, %p466_p5  ;;  %s355_s23 = scalar_lea.vmem %s354_s13, 256 }
  0x1a   : > { %vm185_vm4 = vmand %vm183_vm3, %vm184_vm2  ;;  %p356_p0 = scmp.lt.s32.totalorder %s490_s5, %s354_s13  ;;  %p357_p1 = scmp.lt.s32.totalorder %s355_s23, %s349_s21 }
  0x1b   : > { %vm187_vm6 = vmand %vm185_vm4, %vm186_vm5  ;;  %p352_p13 = pneg %p351_p12 }
  0x1c   : > { %p358_p2 = por %p357_p1, %p356_p0 }
  0x1e   : > { %p359_p3 = pnand %p358_p2, %p352_p13 }
  0x2f   : > { %171 = vperm.xlu0 %344, %v157_v3  }
  0xa2   : > { %v161_v4 = vpop.xlane.xlu0 %160 }
  0xa3   : > { %v162_v5 = vsub.f32 %v156_v1, %v161_v4 }
  0xa5   : > { %v163_v6 = vmul.f32 1.442695, %v162_v5 }
  0xa7   : > { %345 = vpow2.f32 %v163_v6 }
  0xaa   : > { %v172_v9 = vpop.permute.xlu0 %171 }
  0xab   : > { %vm173_vm1 = vcmp.eq.s32.totalorder %v169_v8, %v172_v9 }
  0xac   : > { %v174_v12 = vsel %vm173_vm1, %v162_v5, 0.0 }
  0xad   : > { %v175_v13 = vsel %vm158_vm0, %v174_v12, 0.0 }
  0xb4   : > { %v346_v10 = vpop.eup %345 }
  0xb5   : > { %v165_v11 = vsel %vm158_vm0, %v346_v10, 0.0 }
  0xb6   : > { %166 = vadd.xlane.f32.xlu1 %v165_v11 }
  0xba   : > { %176 = vadd.xlane.f32.xlu1 %v175_v13 }
 0x13f   : > { %v167_v14 = vpop.xlane.xlu1 %166 }
 0x140   : > { %347 = vlog2.f32 %v167_v14 }
 0x143   : > { %v177_v20 = vpop.xlane.xlu1 %176 }
 0x14d   : > { %v348_v18 = vpop.eup %347 }
 0x14e   : > { %v189_v19 = vmul.f32 0.6931472, %v348_v18 }
 0x150   : > { %v190_v21 = vsub.f32 %v189_v19, %v177_v20 }
 0x152   : > { %v191_v22 = vsel %vm187_vm6, %v190_v21, 0.0 }
 0x153   : > { %v193_v23 = vsel %vm192_vm7, %v191_v22, 0.0 }
 0x154   : > { %194 = vadd.xlane.f32.xlu1 %v193_v23 }
 0x1dd   : > { %v195_v24 = vpop.xlane.xlu1 %194 }
 0x1de   : > { %v196_v25 = vrot.slane %v195_v24, 4 }
 0x1e0   : > { %v197_v26 = vadd.f32 %v196_v25, %v195_v24 }
 0x1e2   : > { %v198_v27 = vrot.slane %v197_v26, 2 }
 0x1e4   : > { %v199_v28 = vadd.f32 %v198_v27, %v197_v26 }
 0x1e6   : > { %v200_v29 = vrot.slane %v199_v28, 1 }
 0x1e8   : > { %v201_v30 = vadd.f32 %v200_v29, %v199_v28 }
 0x1ea   : > { %302 = vpush %v201_v30 }
 0x21b   : > { %s303_s7 = spop %302 }
 0x21c   : > { %v203_v31 = vstv %s303_s7 }
 0x21d   : > { %204 = vst [vmem:[%s147_s4] sm:$0xff] %v203_v31 }
 0x21e   : > { %362 = shalt.err (!%p359_p3)
}
 0x21f   : > { %s363_s24 = scalar_lea.hbm %s217_s16, 128  ;;  %s367_s27 = scalar_lea.hbm %s530_s2, 256 }
 0x220   : > { %p364_p4 = scmp.ne.s32.totalorder %s217_s16, %s363_s24  ;;  %p368_p9 = scmp.lt.s32.totalorder %s217_s16, %s530_s2 }
 0x221   : > { %p369_p10 = scmp.lt.s32.totalorder %s367_s27, %s363_s24 }
 0x222   : > { %p365_p7 = pnand %p364_p4, %p466_p5 }
 0x223   : > { %p370_p11 = por %p369_p10, %p368_p9 }
 0x224   : > { %p366_p8 = pneg %p365_p7 }
 0x226   : > { %p371_p12 = pnand %p370_p11, %p366_p8 }
 0x228   : > { %374 = shalt.err (!%p371_p12)
}
 0x229   : > { %304 = dma.vmem_to_hbm [thread:$0]  (%p466_p5), %s490_s5, 128, %s217_s16, %s206_s17  }
 0x22a PF: > { %p310_p13 = scmp.ge.s32.totalorder %s409_s12, 2  ;;  %s231_s30 = sand.u32 1, %s397_s9  }
 0x22b   : > { %s232_s3 = scalar_lea.sflag [#allocation3], %s231_s30 }
 0x22c   : > { %p307_p0 = pnand %p310_p13, %p470_p6 }
 0x22e   : > { %p308_p1 = pneg %p307_p0 }
 0x230   : > { %392 = dma.done.wait (%p308_p1), %s232_s3, 128  }
 0x231   : > { %394 = vsyncadd (%p308_p1), %s232_s3, 4294967168  ;;  %p12_p2 = scmp.ge.s32.totalorder %s453_s15, 4   ;;  %s533_s9 = smov %s401_s10 }
 0x232   : > { %s534_s10 = smov %s405_s11  ;;  %s535_s11 = smov %s464_s18 }
 0x233   : > { %s536_s12 = smov %s453_s15  ;;  %14 = sbr.rel (!%p12_p2) target bundleno = 3 (0x3), region = 66 }
 0x238   :  { %237 = vsyncpa [#allocation3], 1 }
 0x239   :  { %239 = vsyncpa [#allocation3 + $0x1], 1 }

</bundles_post_ra>
